<compile_context>
chip_gen: v5e
topology: v5e:2x2
jax: 0.10.0
libtpu: 0.0.40
codegen_flags: <defaults>
</compile_context>

<pallas_src>
import functools

import jax
import jax.numpy as jnp
from jax.experimental import pallas as pl
from jax.experimental.pallas import tpu as pltpu


def _make_next_type_kernel(num_layers: int, num_types: int):
    """Build the fused NextType kernel for a fixed dense-stack depth / #types."""
    A = num_types

    def kernel(h_ref, emb_ref, batch_ref, *refs):
        out_ref = refs[-1]
        wb_refs = refs[:-1]                 # [w0, b0, w1, b1, ...]  (block-diagonal)
        N = h_ref.shape[0]
        B = out_ref.shape[0]

        # ---- mul_type folded to 2-D: x[n, a*H + k] = h[n, k] * emb[a, k] --------
        h = h_ref[...]                                        # (N, H)
        x = jnp.concatenate([h] * A, axis=1) * emb_ref[...]   # (N, A*H) * (1, A*H)

        # ---- dense stack: block-diagonal weights -> plain 2-D MXU matmuls --------
        for i in range(num_layers):
            w = wb_refs[2 * i][...]
            b = wb_refs[2 * i + 1][...]
            x = jnp.dot(x, w, preferred_element_type=jnp.float32) + b
            if i < num_layers - 1:                            # SiLU between layers
                x = x * jax.nn.sigmoid(x)
        logits = x                                            # (N, A), lane-dense

        # ---- log_softmax over atom types (lane axis) -----------------------------
        m = jnp.max(logits, axis=-1, keepdims=True)
        sh = logits - m
        log_p = sh - jnp.log(jnp.sum(jnp.exp(sh), axis=-1, keepdims=True))   # (N, A)

        # ---- scatter_add over graphs as a one-hot matmul --------------------------
        onehot = (batch_ref[...] ==
                  jax.lax.broadcasted_iota(jnp.int32, (B, N), 0)).astype(jnp.float32)
        agg = jnp.dot(onehot, log_p, preferred_element_type=jnp.float32)     # (B, A)

        # ---- final log-normalization over types -----------------------------------
        m2 = jnp.max(agg, axis=-1, keepdims=True)
        sh2 = agg - m2
        out_ref[...] = sh2 - jnp.log(jnp.sum(jnp.exp(sh2), axis=-1, keepdims=True))

    return kernel


def prepare_next_type_params(emb, dense_ws, dense_bs):
    """One-time parameter preparation (done at setup, NOT per call).

    emb:      (A, H) = embedding.weight.T  (== embedding(eye(A)) in torch)
    dense_ws: list of (d_in, d_out) weights (transposed vs. torch), last d_out == 1
    dense_bs: list of (d_out,) biases
    Returns emb_flat (1, A*H), block-diagonal weights [(A*d_in, A*d_out), ...],
    and tiled biases [(1, A*d_out), ...].
    """
    A, H = emb.shape
    emb_flat = emb.reshape(1, A * H)
    eye_a = jnp.eye(A, dtype=emb.dtype)
    bd_ws, bd_bs = [], []
    for w, b in zip(dense_ws, dense_bs):
        bd_ws.append(jnp.kron(eye_a, w))                      # block-diagonal expansion
        bd_bs.append(jnp.tile(b.reshape(1, -1), (1, A)))
    return emb_flat, bd_ws, bd_bs


@functools.partial(jax.jit, static_argnames=("num_graphs",))
def next_type_forward(h, batch_row, emb_flat, bd_ws, bd_bs, *, num_graphs):
    """h: (N, H) node features; batch_row: (1, N) int32 graph index per node."""
    A = bd_ws[-1].shape[1]                 # last block-diag layer has d_out == A
    flat_params = []
    for w, b in zip(bd_ws, bd_bs):
        flat_params += [w, b]

    vmem = pl.BlockSpec(memory_space=pltpu.MemorySpace.VMEM)
    kernel = _make_next_type_kernel(len(bd_ws), A)
    # NOTE: at production-scale N (thousands of nodes) this should get a grid over the
    # node axis with a (B, A) accumulator scratch (pl.when init/finalize); at toy N the
    # whole problem fits a single VMEM block and a grid would only add overhead.
    return pl.pallas_call(
        kernel,
        out_shape=jax.ShapeDtypeStruct((num_graphs, A), jnp.float32),
        in_specs=[vmem] * (3 + len(flat_params)),
        out_specs=vmem,
    )(h, emb_flat, batch_row.astype(jnp.int32), *flat_params)


if __name__ == "__main__":
    # args.num_ligand_atom_feature = 16, num_hidden_feature = 32, num_dense_layers = 2
    A, H, N, B = 16, 32, 8, 2
    n_dims = [32, 16, 1]          # np.linspace(H, 1, num_dense_layers + 1).astype(int)

    key = jax.random.PRNGKey(0)
    k_h, k_e, kw0, kb0, kw1, kb1 = jax.random.split(key, 6)
    k_layers = [kw0, kb0, kw1, kb1]

    h = jax.random.normal(k_h, (N, H), dtype=jnp.float32)          # data['ligand'].h
    emb = jax.random.normal(k_e, (A, H), dtype=jnp.float32) * 0.3  # embedding.weight.T
    batch = jnp.array([0, 0, 0, 0, 1, 1, 1, 1], dtype=jnp.int32)   # two graphs

    dense_ws, dense_bs = [], []
    for li, (d_in, d_out) in enumerate(zip(n_dims[:-1], n_dims[1:])):
        bound = 1.0 / (d_in ** 0.5)
        dense_ws.append(jax.random.uniform(k_layers[2 * li], (d_in, d_out),
                                           jnp.float32, -bound, bound))
        dense_bs.append(jax.random.uniform(k_layers[2 * li + 1], (d_out,),
                                           jnp.float32, -bound, bound))

    emb_flat, bd_ws, bd_bs = prepare_next_type_params(emb, dense_ws, dense_bs)

    out = next_type_forward(h, batch.reshape(1, N), emb_flat, bd_ws, bd_bs,
                            num_graphs=B)
    jax.block_until_ready(out)

    # ---- pure-JAX reference (mirrors the torch forward) -----------------------------
    mul = h[:, None, :] * emb[None, :, :]                     # (N, A, H)
    x = mul
    for i, (w, b) in enumerate(zip(dense_ws, dense_bs)):
        x = x @ w + b
        if i < len(dense_ws) - 1:
            x = x * jax.nn.sigmoid(x)
    dense_type = x[..., 0]                                    # (N, A)
    log_p = jax.nn.log_softmax(dense_type, axis=-1)
    agg = jax.ops.segment_sum(log_p, batch, num_segments=B)   # scatter_add
    ref = agg - jax.scipy.special.logsumexp(agg, axis=-1, keepdims=True)

    assert out.shape == (B, A)
    assert jnp.allclose(out, ref, atol=1e-3, rtol=1e-3), (out, ref)
    print("KERNEL_OK")
</pallas_src>

<mosaic_0001>
module attributes {stable_mosaic.version = 11 : i64} {
  func.func @kernel(%arg0: memref<8x32xf32, #tpu.memory_space<vmem>>, %arg1: memref<1x512xf32, #tpu.memory_space<vmem>>, %arg2: memref<1x8xi32, #tpu.memory_space<vmem>>, %arg3: memref<512x256xf32, #tpu.memory_space<vmem>>, %arg4: memref<1x256xf32, #tpu.memory_space<vmem>>, %arg5: memref<256x16xf32, #tpu.memory_space<vmem>>, %arg6: memref<1x16xf32, #tpu.memory_space<vmem>>, %arg7: memref<2x16xf32, #tpu.memory_space<vmem>>) attributes {dimension_semantics = [], scalar_prefetch = 0 : i64, scratch_operands = 0 : i64, tpu.core_type = #tpu.core_type<tc>} {
    %c0 = arith.constant 0 : index
    %c0_0 = arith.constant 0 : index
    %0 = vector.load %arg0[%c0, %c0_0] : memref<8x32xf32, #tpu.memory_space<vmem>>, vector<8x32xf32>
    %1 = tpu.concatenate %0, %0, %0, %0, %0, %0, %0, %0, %0, %0, %0, %0, %0, %0, %0, %0 in 1 : vector<8x32xf32>, vector<8x32xf32>, vector<8x32xf32>, vector<8x32xf32>, vector<8x32xf32>, vector<8x32xf32>, vector<8x32xf32>, vector<8x32xf32>, vector<8x32xf32>, vector<8x32xf32>, vector<8x32xf32>, vector<8x32xf32>, vector<8x32xf32>, vector<8x32xf32>, vector<8x32xf32>, vector<8x32xf32> -> vector<8x512xf32>
    %c0_1 = arith.constant 0 : index
    %c0_2 = arith.constant 0 : index
    %2 = vector.load %arg1[%c0_1, %c0_2] : memref<1x512xf32, #tpu.memory_space<vmem>>, vector<1x512xf32>
    %3 = vector.broadcast %2 : vector<1x512xf32> to vector<8x512xf32>
    %4 = arith.mulf %1, %3 : vector<8x512xf32>
    %c0_3 = arith.constant 0 : index
    %c0_4 = arith.constant 0 : index
    %5 = vector.load %arg3[%c0_3, %c0_4] : memref<512x256xf32, #tpu.memory_space<vmem>>, vector<512x256xf32>
    %c0_5 = arith.constant 0 : index
    %c0_6 = arith.constant 0 : index
    %6 = vector.load %arg4[%c0_5, %c0_6] : memref<1x256xf32, #tpu.memory_space<vmem>>, vector<1x256xf32>
    %cst = arith.constant dense<0.000000e+00> : vector<8x256xf32>
    %7 = tpu.matmul %4, %5, %cst {dimension_numbers = #tpu.dot_dimension_numbers<[1], [0], [0], [1], [0, 0, 1, 1], [], []>} : vector<8x512xf32>, vector<512x256xf32>, vector<8x256xf32> -> vector<8x256xf32>
    %8 = vector.broadcast %6 : vector<1x256xf32> to vector<8x256xf32>
    %9 = arith.addf %7, %8 : vector<8x256xf32>
    %10 = arith.negf %9 : vector<8x256xf32>
    %11 = math.exp %10 : vector<8x256xf32>
    %cst_7 = arith.constant 1.000000e+00 : f32
    %12 = vector.broadcast %cst_7 : f32 to vector<8x256xf32>
    %13 = arith.addf %12, %11 : vector<8x256xf32>
    %14 = arith.divf %12, %13 : vector<8x256xf32>
    %15 = arith.mulf %9, %14 : vector<8x256xf32>
    %c0_8 = arith.constant 0 : index
    %c0_9 = arith.constant 0 : index
    %16 = vector.load %arg5[%c0_8, %c0_9] : memref<256x16xf32, #tpu.memory_space<vmem>>, vector<256x16xf32>
    %c0_10 = arith.constant 0 : index
    %c0_11 = arith.constant 0 : index
    %17 = vector.load %arg6[%c0_10, %c0_11] : memref<1x16xf32, #tpu.memory_space<vmem>>, vector<1x16xf32>
    %cst_12 = arith.constant dense<0.000000e+00> : vector<8x16xf32>
    %18 = tpu.matmul %15, %16, %cst_12 {dimension_numbers = #tpu.dot_dimension_numbers<[1], [0], [0], [1], [0, 0, 1, 1], [], []>} : vector<8x256xf32>, vector<256x16xf32>, vector<8x16xf32> -> vector<8x16xf32>
    %19 = vector.broadcast %17 : vector<1x16xf32> to vector<8x16xf32>
    %20 = arith.addf %18, %19 : vector<8x16xf32>
    %cst_13 = arith.constant dense<0xFF800000> : vector<8xf32>
    %21 = vector.multi_reduction <maximumf>, %20, %cst_13 [1] : vector<8x16xf32> to vector<8xf32>
    %22 = vector.shape_cast %21 : vector<8xf32> to vector<8x1xf32>
    %23 = vector.broadcast %22 : vector<8x1xf32> to vector<8x16xf32>
    %24 = arith.subf %20, %23 : vector<8x16xf32>
    %25 = math.exp %24 : vector<8x16xf32>
    %cst_14 = arith.constant dense<0.000000e+00> : vector<8xf32>
    %26 = vector.multi_reduction <add>, %25, %cst_14 [1] : vector<8x16xf32> to vector<8xf32>
    %27 = vector.shape_cast %26 : vector<8xf32> to vector<8x1xf32>
    %28 = math.log %27 : vector<8x1xf32>
    %29 = vector.broadcast %28 : vector<8x1xf32> to vector<8x16xf32>
    %30 = arith.subf %24, %29 : vector<8x16xf32>
    %c0_15 = arith.constant 0 : index
    %c0_16 = arith.constant 0 : index
    %31 = vector.load %arg2[%c0_15, %c0_16] : memref<1x8xi32, #tpu.memory_space<vmem>>, vector<1x8xi32>
    %32 = tpu.iota {dimensions = array<i32: 0>} : vector<2x8xi32>
    %33 = vector.broadcast %31 : vector<1x8xi32> to vector<2x8xi32>
    %34 = arith.cmpi eq, %33, %32 : vector<2x8xi32>
    %35 = arith.extui %34 : vector<2x8xi1> to vector<2x8xi32>
    %36 = arith.sitofp %35 : vector<2x8xi32> to vector<2x8xf32>
    %cst_17 = arith.constant dense<0.000000e+00> : vector<2x16xf32>
    %37 = tpu.matmul %36, %30, %cst_17 {dimension_numbers = #tpu.dot_dimension_numbers<[1], [0], [0], [1], [0, 0, 1, 1], [], []>} : vector<2x8xf32>, vector<8x16xf32>, vector<2x16xf32> -> vector<2x16xf32>
    %cst_18 = arith.constant dense<0xFF800000> : vector<2xf32>
    %38 = vector.multi_reduction <maximumf>, %37, %cst_18 [1] : vector<2x16xf32> to vector<2xf32>
    %39 = vector.shape_cast %38 : vector<2xf32> to vector<2x1xf32>
    %40 = vector.broadcast %39 : vector<2x1xf32> to vector<2x16xf32>
    %41 = arith.subf %37, %40 : vector<2x16xf32>
    %42 = math.exp %41 : vector<2x16xf32>
    %cst_19 = arith.constant dense<0.000000e+00> : vector<2xf32>
    %43 = vector.multi_reduction <add>, %42, %cst_19 [1] : vector<2x16xf32> to vector<2xf32>
    %44 = vector.shape_cast %43 : vector<2xf32> to vector<2x1xf32>
    %45 = math.log %44 : vector<2x1xf32>
    %46 = vector.broadcast %45 : vector<2x1xf32> to vector<2x16xf32>
    %47 = arith.subf %41, %46 : vector<2x16xf32>
    %c0_20 = arith.constant 0 : index
    %c0_21 = arith.constant 0 : index
    %48 = vector.load %arg7[%c0_20, %c0_21] : memref<2x16xf32, #tpu.memory_space<vmem>>, vector<2x16xf32>
    tpu.vector_store %arg7[%c0_20, %c0_21], %47 {strides = array<i32>} : memref<2x16xf32, #tpu.memory_space<vmem>>, vector<2x16xf32>,
    return
  }
}

</mosaic_0001>

<bundles_post_ra>
// kernel: next_type_forward.1
= control target key start
LH: loop header
LB: loop body
LE: loop exit
PB: predicated region body
PF: predicated region fallthrough
CT: control target
= control target key end

     0   :  { %12 = vsyncpa [#allocation3], 0  ;;  %s815_s0 = inlined_call_operand.vmem [shape: f32[8,32], index: 0, kind: input, shape index: {}]   ;;  %s816_s1 = inlined_call_operand.vmem [shape: f32[1,512], index: 1, kind: input, shape index: {}]   ;;  %s817_s2 = inlined_call_operand.vmem [shape: s32[1,8], index: 2, kind: input, shape index: {}]   ;;  %s818_s3 = inlined_call_operand.hbm [shape: f32[512,256], index: 3, kind: input, shape index: {}]   ;;  %s819_s4 = inlined_call_operand.vmem [shape: f32[1,256], index: 4, kind: input, shape index: {}]   ;;  %s820_s5 = inlined_call_operand.vmem [shape: f32[256,16], index: 5, kind: input, shape index: {}]   ;;  %s821_s6 = inlined_call_operand.vmem [shape: f32[1,16], index: 6, kind: input, shape index: {}]   ;;  %s822_s7 = inlined_call_operand.hbm [shape: f32[2,16], index: 7, kind: output, shape index: {}]  }
   0x1   :  { %13 = vsyncpa [#allocation4], 0  ;;  %s24_s26 = sshll.u32 %s818_s3, 4  ;;  %s641_s27 = smov [#allocation2]   ;;  %s25_s26 = int_to_ptr.hbm [resolvable:$true] %s24_s26 }
   0x2   :  { %s26_s28 = sshll.u32 %s641_s27, 4  ;;  %s642_s29 = smov 256   ;;  %s27_s28 = int_to_ptr.vmem [resolvable:$true] %s26_s28 }
   0x3   :  { %s643_s30 = smov 16  }
   0x4   :  { %32 = dma.hbm_to_vmem [thread:$0]  %s25_s26, 16384, %s27_s28, [#allocation3], %s642_s29, %s642_s29, %s643_s30  }
   0x5   :  { %637 = dma.done.wait [#allocation3], 16384  }
   0x6   :  { %638 = vsyncadd [#allocation3], 4294950912  ;;  %v695_v0 = vld [vmem:[%s815_s0] sm:$0xff]  ;;  %v104_v1 = vld [vmem:[#allocation2 + $0xf0] sm:$0xff]  ;;  %s644_s10 = smov 32   ;;  %s645_s3 = smov 96  }
   0x7   :  { %v136_v2 = vld [vmem:[#allocation2 + $0x1f0] sm:$0xff]  ;;  %45 = vrot.lane.b32.xlu0 %v695_v0, %s644_s10  ;;  %51 = vrot.lane.b32.xlu1 %v695_v0, %s645_s3  ;;  %v102_v5 = vld [vmem:[#allocation2 + $0xe0] sm:$0xff]  ;;  %s646_s0 = smov 64   ;;  %vm54_vm0 = vcmask 261120   ;;  %vm56_vm1 = vcmask 523264   ;;  %vm58_vm2 = vcmask 785408  }
   0x8   :  { %v168_v3 = vld [vmem:[#allocation2 + $0x2f0] sm:$0xff]  ;;  %208 = vmatpush.msra.mxu0 %v104_v1  ;;  %228 = vmatpush.msra.mxu1 %v136_v2  ;;  %v134_v6 = vld [vmem:[#allocation2 + $0x1e0] sm:$0xff]  ;;  %v105_v2 = vld [vmem:[#allocation2 + $0xf8] sm:$0xff]  ;;  %vm484_vm11 = vcmask 130048   ;;  %vm504_vm13 = vcmask 64512   ;;  %vm528_vm14 = vcmask 123904  }
   0x9   :  { %v200_v4 = vld [vmem:[#allocation2 + $0x3f0] sm:$0xff]  ;;  %v166_v7 = vld [vmem:[#allocation2 + $0x2e0] sm:$0xff]  ;;  %248 = vmatpush.msra.mxu2 %v168_v3  ;;  %v137_v3 = vld [vmem:[#allocation2 + $0x1f8] sm:$0xff]  ;;  %s549_s29 = sshll.u32 %s822_s7, 4  ;;  %s550_s29 = int_to_ptr.hbm [resolvable:$true] %s549_s29 }
   0xa   :  { %v198_v8 = vld [vmem:[#allocation2 + $0x3e0] sm:$0xff]  ;;  %268 = vmatpush.msra.mxu3 %v200_v4  ;;  %v100_v9 = vld [vmem:[#allocation2 + $0xd0] sm:$0xff]  ;;  %209 = vmatpush.msra.mxu0 %v102_v5  ;;  %v169_v4 = vld [vmem:[#allocation2 + $0x2f8] sm:$0xff] }
   0xb   :  { %v132_v10 = vld [vmem:[#allocation2 + $0x1d0] sm:$0xff]  ;;  %229 = vmatpush.msra.mxu1 %v134_v6  ;;  %249 = vmatpush.msra.mxu2 %v166_v7  ;;  %v98_v13 = vld [vmem:[#allocation2 + $0xc0] sm:$0xff]  ;;  %v201_v5 = vld [vmem:[#allocation2 + $0x3f8] sm:$0xff] }
   0xc   :  { %v164_v11 = vld [vmem:[#allocation2 + $0x2d0] sm:$0xff]  ;;  %269 = vmatpush.msra.mxu3 %v198_v8  ;;  %v130_v14 = vld [vmem:[#allocation2 + $0x1c0] sm:$0xff]  ;;  %210 = vmatpush.msra.mxu0 %v100_v9  ;;  %v103_v6 = vld [vmem:[#allocation2 + $0xe8] sm:$0xff] }
   0xd   :  { %v196_v12 = vld [vmem:[#allocation2 + $0x3d0] sm:$0xff]  ;;  %230 = vmatpush.msra.mxu1 %v132_v10  ;;  %v162_v15 = vld [vmem:[#allocation2 + $0x2c0] sm:$0xff]  ;;  %250 = vmatpush.msra.mxu2 %v164_v11  ;;  %v135_v7 = vld [vmem:[#allocation2 + $0x1e8] sm:$0xff] }
   0xe   :  { %270 = vmatpush.msra.mxu3 %v196_v12  ;;  %v194_v16 = vld [vmem:[#allocation2 + $0x3c0] sm:$0xff]  ;;  %v96_v17 = vld [vmem:[#allocation2 + $0xb0] sm:$0xff]  ;;  %211 = vmatpush.msra.mxu0 %v98_v13  ;;  %v167_v8 = vld [vmem:[#allocation2 + $0x2e8] sm:$0xff] }
   0xf   :  { %231 = vmatpush.msra.mxu1 %v130_v14  ;;  %v128_v18 = vld [vmem:[#allocation2 + $0x1b0] sm:$0xff]  ;;  %48 = vrot.lane.b32.xlu0 %v695_v0, %s646_s0  ;;  %v94_v21 = vld [vmem:[#allocation2 + $0xa0] sm:$0xff]  ;;  %v199_v9 = vld [vmem:[#allocation2 + $0x3e8] sm:$0xff] }
  0x10   :  { %v160_v19 = vld [vmem:[#allocation2 + $0x2b0] sm:$0xff]  ;;  %251 = vmatpush.msra.mxu2 %v162_v15  ;;  %271 = vmatpush.msra.mxu3 %v194_v16  ;;  %v126_v22 = vld [vmem:[#allocation2 + $0x1a0] sm:$0xff]  ;;  %v101_v10 = vld [vmem:[#allocation2 + $0xd8] sm:$0xff] }
  0x11   :  { %v192_v20 = vld [vmem:[#allocation2 + $0x3b0] sm:$0xff]  ;;  %212 = vmatpush.msra.mxu0 %v96_v17  ;;  %v158_v23 = vld [vmem:[#allocation2 + $0x2a0] sm:$0xff]  ;;  %232 = vmatpush.msra.mxu1 %v128_v18  ;;  %v133_v11 = vld [vmem:[#allocation2 + $0x1d8] sm:$0xff] }
  0x12   :  { %252 = vmatpush.msra.mxu2 %v160_v19  ;;  %v190_v24 = vld [vmem:[#allocation2 + $0x3a0] sm:$0xff]  ;;  %v92_v25 = vld [vmem:[#allocation2 + $0x90] sm:$0xff]  ;;  %272 = vmatpush.msra.mxu3 %v192_v20  ;;  %v165_v12 = vld [vmem:[#allocation2 + $0x2d8] sm:$0xff] }
  0x13   :  { %213 = vmatpush.msra.mxu0 %v94_v21  ;;  %v124_v26 = vld [vmem:[#allocation2 + $0x190] sm:$0xff]  ;;  %233 = vmatpush.msra.mxu1 %v126_v22  ;;  %v90_v29 = vld [vmem:[#allocation2 + $0x80] sm:$0xff]  ;;  %v197_v13 = vld [vmem:[#allocation2 + $0x3d8] sm:$0xff] }
  0x14   :  { %v156_v27 = vld [vmem:[#allocation2 + $0x290] sm:$0xff]  ;;  %253 = vmatpush.msra.mxu2 %v158_v23  ;;  %273 = vmatpush.msra.mxu3 %v190_v24  ;;  %v122_v30 = vld [vmem:[#allocation2 + $0x180] sm:$0xff]  ;;  %v99_v14 = vld [vmem:[#allocation2 + $0xc8] sm:$0xff] }
  0x15   :  { %v188_v28 = vld [vmem:[#allocation2 + $0x390] sm:$0xff]  ;;  %214 = vmatpush.msra.mxu0 %v92_v25  ;;  %v154_v31 = vld [vmem:[#allocation2 + $0x280] sm:$0xff]  ;;  %234 = vmatpush.msra.mxu1 %v124_v26  ;;  %v131_v15 = vld [vmem:[#allocation2 + $0x1c8] sm:$0xff] }
  0x16   :  { %254 = vmatpush.msra.mxu2 %v156_v27  ;;  %v186_v32 = vld [vmem:[#allocation2 + $0x380] sm:$0xff]  ;;  %v88_v33 = vld [vmem:[#allocation2 + $0x70] sm:$0xff]  ;;  %274 = vmatpush.msra.mxu3 %v188_v28  ;;  %v163_v16 = vld [vmem:[#allocation2 + $0x2c8] sm:$0xff] }
  0x17   :  { %215 = vmatpush.msra.mxu0 %v90_v29  ;;  %v120_v34 = vld [vmem:[#allocation2 + $0x170] sm:$0xff]  ;;  %235 = vmatpush.msra.mxu1 %v122_v30  ;;  %v86_v37 = vld [vmem:[#allocation2 + $0x60] sm:$0xff]  ;;  %v195_v17 = vld [vmem:[#allocation2 + $0x3c8] sm:$0xff] }
  0x18   :  { %v152_v35 = vld [vmem:[#allocation2 + $0x270] sm:$0xff]  ;;  %255 = vmatpush.msra.mxu2 %v154_v31  ;;  %275 = vmatpush.msra.mxu3 %v186_v32  ;;  %v118_v38 = vld [vmem:[#allocation2 + $0x160] sm:$0xff]  ;;  %v97_v18 = vld [vmem:[#allocation2 + $0xb8] sm:$0xff] }
  0x19   :  { %v184_v36 = vld [vmem:[#allocation2 + $0x370] sm:$0xff]  ;;  %216 = vmatpush.msra.mxu0 %v88_v33  ;;  %v150_v39 = vld [vmem:[#allocation2 + $0x260] sm:$0xff]  ;;  %236 = vmatpush.msra.mxu1 %v120_v34  ;;  %v129_v19 = vld [vmem:[#allocation2 + $0x1b8] sm:$0xff] }
  0x1a   :  { %256 = vmatpush.msra.mxu2 %v152_v35  ;;  %v182_v40 = vld [vmem:[#allocation2 + $0x360] sm:$0xff]  ;;  %v84_v41 = vld [vmem:[#allocation2 + $0x50] sm:$0xff]  ;;  %276 = vmatpush.msra.mxu3 %v184_v36  ;;  %v161_v20 = vld [vmem:[#allocation2 + $0x2b8] sm:$0xff] }
  0x1b   :  { %217 = vmatpush.msra.mxu0 %v86_v37  ;;  %v116_v42 = vld [vmem:[#allocation2 + $0x150] sm:$0xff]  ;;  %237 = vmatpush.msra.mxu1 %v118_v38  ;;  %v82_v45 = vld [vmem:[#allocation2 + $0x40] sm:$0xff]  ;;  %v193_v21 = vld [vmem:[#allocation2 + $0x3b8] sm:$0xff] }
  0x1c   :  { %v148_v43 = vld [vmem:[#allocation2 + $0x250] sm:$0xff]  ;;  %257 = vmatpush.msra.mxu2 %v150_v39  ;;  %277 = vmatpush.msra.mxu3 %v182_v40  ;;  %v114_v46 = vld [vmem:[#allocation2 + $0x140] sm:$0xff]  ;;  %v95_v22 = vld [vmem:[#allocation2 + $0xa8] sm:$0xff] }
  0x1d   :  { %v180_v44 = vld [vmem:[#allocation2 + $0x350] sm:$0xff]  ;;  %218 = vmatpush.msra.mxu0 %v84_v41  ;;  %v146_v47 = vld [vmem:[#allocation2 + $0x240] sm:$0xff]  ;;  %238 = vmatpush.msra.mxu1 %v116_v42  ;;  %v127_v23 = vld [vmem:[#allocation2 + $0x1a8] sm:$0xff] }
  0x1e   :  { %258 = vmatpush.msra.mxu2 %v148_v43  ;;  %v178_v48 = vld [vmem:[#allocation2 + $0x340] sm:$0xff]  ;;  %v80_v49 = vld [vmem:[#allocation2 + $0x30] sm:$0xff]  ;;  %278 = vmatpush.msra.mxu3 %v180_v44  ;;  %v159_v24 = vld [vmem:[#allocation2 + $0x2a8] sm:$0xff] }
  0x1f   :  { %219 = vmatpush.msra.mxu0 %v82_v45  ;;  %v112_v50 = vld [vmem:[#allocation2 + $0x130] sm:$0xff]  ;;  %239 = vmatpush.msra.mxu1 %v114_v46  ;;  %v78_v53 = vld [vmem:[#allocation2 + $0x20] sm:$0xff]  ;;  %v191_v25 = vld [vmem:[#allocation2 + $0x3a8] sm:$0xff] }
  0x20   :  { %v144_v51 = vld [vmem:[#allocation2 + $0x230] sm:$0xff]  ;;  %259 = vmatpush.msra.mxu2 %v146_v47  ;;  %279 = vmatpush.msra.mxu3 %v178_v48  ;;  %v110_v54 = vld [vmem:[#allocation2 + $0x120] sm:$0xff]  ;;  %v93_v26 = vld [vmem:[#allocation2 + $0x98] sm:$0xff] }
  0x21   :  { %v176_v52 = vld [vmem:[#allocation2 + $0x330] sm:$0xff]  ;;  %220 = vmatpush.msra.mxu0 %v80_v49  ;;  %v142_v55 = vld [vmem:[#allocation2 + $0x220] sm:$0xff]  ;;  %240 = vmatpush.msra.mxu1 %v112_v50  ;;  %v125_v27 = vld [vmem:[#allocation2 + $0x198] sm:$0xff] }
  0x22   :  { %260 = vmatpush.msra.mxu2 %v144_v51  ;;  %v174_v56 = vld [vmem:[#allocation2 + $0x320] sm:$0xff]  ;;  %v76_v57 = vld [vmem:[#allocation2 + $0x10] sm:$0xff]  ;;  %280 = vmatpush.msra.mxu3 %v176_v52  ;;  %v157_v28 = vld [vmem:[#allocation2 + $0x298] sm:$0xff] }
  0x23   :  { %221 = vmatpush.msra.mxu0 %v78_v53  ;;  %v108_v58 = vld [vmem:[#allocation2 + $0x110] sm:$0xff]  ;;  %241 = vmatpush.msra.mxu1 %v110_v54  ;;  %v74_v61 = vld [vmem:[#allocation2] sm:$0xff]  ;;  %v189_v29 = vld [vmem:[#allocation2 + $0x398] sm:$0xff] }
  0x24   :  { %v140_v59 = vld [vmem:[#allocation2 + $0x210] sm:$0xff]  ;;  %261 = vmatpush.msra.mxu2 %v142_v55  ;;  %281 = vmatpush.msra.mxu3 %v174_v56  ;;  %v106_v62 = vld [vmem:[#allocation2 + $0x100] sm:$0xff]  ;;  %v91_v30 = vld [vmem:[#allocation2 + $0x88] sm:$0xff] }
  0x25   :  { %v172_v60 = vld [vmem:[#allocation2 + $0x310] sm:$0xff]  ;;  %222 = vmatpush.msra.mxu0 %v76_v57  ;;  %v138_v63 = vld [vmem:[#allocation2 + $0x200] sm:$0xff]  ;;  %242 = vmatpush.msra.mxu1 %v108_v58  ;;  %v123_v31 = vld [vmem:[#allocation2 + $0x188] sm:$0xff] }
  0x26   :  { %262 = vmatpush.msra.mxu2 %v140_v59  ;;  %v170_v1 = vld [vmem:[#allocation2 + $0x300] sm:$0xff]  ;;  %282 = vmatpush.msra.mxu3 %v172_v60  ;;  %v155_v32 = vld [vmem:[#allocation2 + $0x288] sm:$0xff]  ;;  %v89_v34 = vld [vmem:[#allocation2 + $0x78] sm:$0xff] }
  0x27   :  { %223 = vmatpush.msra.mxu0 %v74_v61  ;;  %243 = vmatpush.msra.mxu1 %v106_v62  ;;  %v187_v33 = vld [vmem:[#allocation2 + $0x388] sm:$0xff]  ;;  %v121_v35 = vld [vmem:[#allocation2 + $0x178] sm:$0xff] }
  0x28   :  { %263 = vmatpush.msra.mxu2 %v138_v63  ;;  %283 = vmatpush.msra.mxu3 %v170_v1  ;;  %v153_v36 = vld [vmem:[#allocation2 + $0x278] sm:$0xff]  ;;  %v87_v38 = vld [vmem:[#allocation2 + $0x68] sm:$0xff] }
  0x29   :  { %288 = vmatpush.msrb.mxu0 %v105_v2  ;;  %308 = vmatpush.msrb.mxu1 %v137_v3  ;;  %v185_v37 = vld [vmem:[#allocation2 + $0x378] sm:$0xff]  ;;  %v119_v39 = vld [vmem:[#allocation2 + $0x168] sm:$0xff] }
  0x2a   :  { %328 = vmatpush.msrb.mxu2 %v169_v4  ;;  %348 = vmatpush.msrb.mxu3 %v201_v5  ;;  %v151_v40 = vld [vmem:[#allocation2 + $0x268] sm:$0xff]  ;;  %v85_v42 = vld [vmem:[#allocation2 + $0x58] sm:$0xff]  ;;  %v60_v4 = vld [vmem:[%s816_s1] sm:$0xf] }
  0x2b   :  { %289 = vmatpush.msrb.mxu0 %v103_v6  ;;  %309 = vmatpush.msrb.mxu1 %v135_v7  ;;  %v183_v41 = vld [vmem:[#allocation2 + $0x368] sm:$0xff]  ;;  %v117_v43 = vld [vmem:[#allocation2 + $0x158] sm:$0xff]  ;;  %v62_v6 = vperm.slane %v60_v4, 0  ;;  %v63_v7 = vperm.slane %v60_v4, 1 }
  0x2c   :  { %329 = vmatpush.msrb.mxu2 %v167_v8  ;;  %349 = vmatpush.msrb.mxu3 %v199_v9  ;;  %v149_v44 = vld [vmem:[#allocation2 + $0x258] sm:$0xff]  ;;  %v83_v46 = vld [vmem:[#allocation2 + $0x48] sm:$0xff]  ;;  %v64_v8 = vperm.slane %v60_v4, 2  ;;  %v65_v9 = vperm.slane %v60_v4, 3 }
  0x2d   :  { %290 = vmatpush.msrb.mxu0 %v101_v10  ;;  %310 = vmatpush.msrb.mxu1 %v133_v11  ;;  %v181_v45 = vld [vmem:[#allocation2 + $0x358] sm:$0xff]  ;;  %v115_v47 = vld [vmem:[#allocation2 + $0x148] sm:$0xff] }
  0x2e   :  { %330 = vmatpush.msrb.mxu2 %v165_v12  ;;  %350 = vmatpush.msrb.mxu3 %v197_v13  ;;  %v147_v48 = vld [vmem:[#allocation2 + $0x248] sm:$0xff]  ;;  %v81_v50 = vld [vmem:[#allocation2 + $0x38] sm:$0xff] }
  0x2f   :  { %291 = vmatpush.msrb.mxu0 %v99_v14  ;;  %311 = vmatpush.msrb.mxu1 %v131_v15  ;;  %v179_v49 = vld [vmem:[#allocation2 + $0x348] sm:$0xff]  ;;  %v113_v51 = vld [vmem:[#allocation2 + $0x138] sm:$0xff] }
  0x30   :  { %331 = vmatpush.msrb.mxu2 %v163_v16  ;;  %351 = vmatpush.msrb.mxu3 %v195_v17  ;;  %v145_v52 = vld [vmem:[#allocation2 + $0x238] sm:$0xff]  ;;  %v79_v54 = vld [vmem:[#allocation2 + $0x28] sm:$0xff] }
  0x31   :  { %292 = vmatpush.msrb.mxu0 %v97_v18  ;;  %312 = vmatpush.msrb.mxu1 %v129_v19  ;;  %v177_v53 = vld [vmem:[#allocation2 + $0x338] sm:$0xff]  ;;  %v111_v55 = vld [vmem:[#allocation2 + $0x128] sm:$0xff] }
  0x32   :  { %332 = vmatpush.msrb.mxu2 %v161_v20  ;;  %352 = vmatpush.msrb.mxu3 %v193_v21  ;;  %v143_v56 = vld [vmem:[#allocation2 + $0x228] sm:$0xff]  ;;  %v77_v58 = vld [vmem:[#allocation2 + $0x18] sm:$0xff]  ;;  %v420_v20 = vld [vmem:[%s820_s5 + $0x60] sm:$0xff] }
  0x33   :  { %293 = vmatpush.msrb.mxu0 %v95_v22  ;;  %313 = vmatpush.msrb.mxu1 %v127_v23  ;;  %v175_v57 = vld [vmem:[#allocation2 + $0x328] sm:$0xff]  ;;  %v109_v59 = vld [vmem:[#allocation2 + $0x118] sm:$0xff]  ;;  %v418_v23 = vld [vmem:[%s820_s5 + $0x50] sm:$0xff] }
  0x34   :  { %333 = vmatpush.msrb.mxu2 %v159_v24  ;;  %353 = vmatpush.msrb.mxu3 %v191_v25  ;;  %v141_v60 = vld [vmem:[#allocation2 + $0x218] sm:$0xff]  ;;  %v75_v62 = vld [vmem:[#allocation2 + $0x8] sm:$0xff]  ;;  %v438_v24 = vld [vmem:[%s820_s5 + $0xf0] sm:$0xff] }
  0x35   :  { %294 = vmatpush.msrb.mxu0 %v93_v26  ;;  %314 = vmatpush.msrb.mxu1 %v125_v27  ;;  %v173_v61 = vld [vmem:[#allocation2 + $0x318] sm:$0xff]  ;;  %v107_v63 = vld [vmem:[#allocation2 + $0x108] sm:$0xff]  ;;  %v416_v27 = vld [vmem:[%s820_s5 + $0x40] sm:$0xff] }
  0x36   :  { %334 = vmatpush.msrb.mxu2 %v157_v28  ;;  %354 = vmatpush.msrb.mxu3 %v189_v29  ;;  %v139_v1 = vld [vmem:[#allocation2 + $0x208] sm:$0xff]  ;;  %v423_v18 = vld [vmem:[%s820_s5 + $0x78] sm:$0xff]  ;;  %v436_v28 = vld [vmem:[%s820_s5 + $0xe0] sm:$0xff] }
  0x37   :  { %295 = vmatpush.msrb.mxu0 %v91_v30  ;;  %315 = vmatpush.msrb.mxu1 %v123_v31  ;;  %v171_v2 = vld [vmem:[#allocation2 + $0x308] sm:$0xff]  ;;  %v419_v21 = vld [vmem:[%s820_s5 + $0x58] sm:$0xff]  ;;  %v202_v31 = vld [vmem:[%s819_s4] sm:$0x3] }
  0x38   :  { %335 = vmatpush.msrb.mxu2 %v155_v32  ;;  %355 = vmatpush.msrb.mxu3 %v187_v33  ;;  %v421_v19 = vld [vmem:[%s820_s5 + $0x68] sm:$0xff]  ;;  %v439_v22 = vld [vmem:[%s820_s5 + $0xf8] sm:$0xff]  ;;  %v414_v32 = vld [vmem:[%s820_s5 + $0x30] sm:$0xff] }
  0x39   :  { %296 = vmatpush.msrb.mxu0 %v89_v34  ;;  %316 = vmatpush.msrb.mxu1 %v121_v35  ;;  %v417_v25 = vld [vmem:[%s820_s5 + $0x48] sm:$0xff]  ;;  %v415_v29 = vld [vmem:[%s820_s5 + $0x38] sm:$0xff]  ;;  %v434_v33 = vld [vmem:[%s820_s5 + $0xd0] sm:$0xff]  ;;  %v204_v34 = vperm.slane %v202_v31, 0 }
  0x3a   :  { %336 = vmatpush.msrb.mxu2 %v153_v36  ;;  %356 = vmatpush.msrb.mxu3 %v185_v37  ;;  %v437_v26 = vld [vmem:[%s820_s5 + $0xe8] sm:$0xff]  ;;  %v435_v30 = vld [vmem:[%s820_s5 + $0xd8] sm:$0xff] }
  0x3b   :  { %297 = vmatpush.msrb.mxu0 %v87_v38  ;;  %317 = vmatpush.msrb.mxu1 %v119_v39  ;;  %v413_v35 = vld [vmem:[%s820_s5 + $0x28] sm:$0xff]  ;;  %v412_v38 = vld [vmem:[%s820_s5 + $0x20] sm:$0xff] }
  0x3c   :  { %337 = vmatpush.msrb.mxu2 %v151_v40  ;;  %357 = vmatpush.msrb.mxu3 %v183_v41  ;;  %v433_v36 = vld [vmem:[%s820_s5 + $0xc8] sm:$0xff]  ;;  %v432_v39 = vld [vmem:[%s820_s5 + $0xc0] sm:$0xff]  ;;  %v411_v41 = vld [vmem:[%s820_s5 + $0x18] sm:$0xff] }
  0x3d   :  { %298 = vmatpush.msrb.mxu0 %v85_v42  ;;  %318 = vmatpush.msrb.mxu1 %v117_v43  ;;  %v431_v42 = vld [vmem:[%s820_s5 + $0xb8] sm:$0xff] }
  0x3e   :  { %338 = vmatpush.msrb.mxu2 %v149_v44  ;;  %358 = vmatpush.msrb.mxu3 %v181_v45  ;;  %v410_v44 = vld [vmem:[%s820_s5 + $0x10] sm:$0xff] }
  0x3f   :  { %299 = vmatpush.msrb.mxu0 %v83_v46  ;;  %319 = vmatpush.msrb.mxu1 %v115_v47  ;;  %v430_v45 = vld [vmem:[%s820_s5 + $0xb0] sm:$0xff]  ;;  %v205_v47 = vperm.slane %v202_v31, 1 }
  0x40   :  { %339 = vmatpush.msrb.mxu2 %v147_v48  ;;  %359 = vmatpush.msrb.mxu3 %v179_v49  ;;  %v409_v48 = vld [vmem:[%s820_s5 + $0x8] sm:$0xff] }
  0x41   :  { %300 = vmatpush.msrb.mxu0 %v81_v50  ;;  %320 = vmatpush.msrb.mxu1 %v113_v51  ;;  %v429_v49 = vld [vmem:[%s820_s5 + $0xa8] sm:$0xff] }
  0x42   :  { %340 = vmatpush.msrb.mxu2 %v145_v52  ;;  %360 = vmatpush.msrb.mxu3 %v177_v53 }
  0x43   :  { %301 = vmatpush.msrb.mxu0 %v79_v54  ;;  %321 = vmatpush.msrb.mxu1 %v111_v55  ;;  %v408_v54 = vld [vmem:[%s820_s5] sm:$0xff] }
  0x44   :  { %341 = vmatpush.msrb.mxu2 %v143_v56  ;;  %361 = vmatpush.msrb.mxu3 %v175_v57  ;;  %v428_v55 = vld [vmem:[%s820_s5 + $0xa0] sm:$0xff] }
  0x45   :  { %302 = vmatpush.msrb.mxu0 %v77_v58  ;;  %322 = vmatpush.msrb.mxu1 %v109_v59  ;;  %v427_v58 = vld [vmem:[%s820_s5 + $0x98] sm:$0xff] }
  0x46   :  { %342 = vmatpush.msrb.mxu2 %v141_v60  ;;  %362 = vmatpush.msrb.mxu3 %v173_v61  ;;  %v426_v60 = vld [vmem:[%s820_s5 + $0x90] sm:$0xff] }
  0x47   :  { %303 = vmatpush.msrb.mxu0 %v75_v62  ;;  %323 = vmatpush.msrb.mxu1 %v107_v63  ;;  %v425_v63 = vld [vmem:[%s820_s5 + $0x88] sm:$0xff] }
  0x48   :  { %343 = vmatpush.msrb.mxu2 %v139_v1  ;;  %363 = vmatpush.msrb.mxu3 %v171_v2 }
  0x79   :  { %v46_v3 = vpop.permute.xlu0 %45  ;;  %v52_v5 = vpop.permute.xlu1 %51 }
  0x7a   :  { %v55_v10 = vsel %vm54_vm0, %v695_v0, %v46_v3  ;;  %v422_v0 = vld [vmem:[%s820_s5 + $0x70] sm:$0xff]  ;;  %v424_v3 = vld [vmem:[%s820_s5 + $0x80] sm:$0xff] }
  0x81   :  { %v49_v11 = vpop.permute.xlu0 %48 }
  0x82   :  { %v57_v12 = vsel %vm56_vm1, %v55_v10, %v49_v11 }
  0x83   :  { %v59_v13 = vsel %vm58_vm2, %v57_v12, %v52_v5 }
  0x84   :  { %v70_v14 = vmul.f32 %v62_v6, %v59_v13  ;;  %v71_v15 = vmul.f32 %v63_v7, %v59_v13  ;;  %v72_v16 = vmul.f32 %v64_v8, %v59_v13  ;;  %v73_v17 = vmul.f32 %v65_v9, %v59_v13 }
  0x86   :  { %224 = vmatmul.f32.vlgmr.msra.gmra.mxu0 %v70_v14  ;;  %244 = vmatmul.f32.vlgmr.msra.gmra.mxu1 %v71_v15 }
  0x87   :  { %264 = vmatmul.f32.vlgmr.msra.gmra.mxu2 %v72_v16  ;;  %284 = vmatmul.f32.vlgmr.msra.gmra.mxu3 %v73_v17 }
  0x88   :  { %444 = vmatpush.msra.mxu0 %v423_v18  ;;  %464 = vmatpush.msra.mxu1 %v439_v22 }
  0x8a   :  { %445 = vmatpush.msra.mxu0 %v422_v0  ;;  %465 = vmatpush.msra.mxu1 %v438_v24 }
  0x8c   :  { %446 = vmatpush.msra.mxu0 %v421_v19  ;;  %466 = vmatpush.msra.mxu1 %v437_v26 }
  0x8e   :  { %304 = vmatmul.f32.vlgmr.msrb.gmra.mxu0 %v70_v14  ;;  %324 = vmatmul.f32.vlgmr.msrb.gmra.mxu1 %v71_v15 }
  0x8f   :  { %344 = vmatmul.f32.vlgmr.msrb.gmra.mxu2 %v72_v16  ;;  %364 = vmatmul.f32.vlgmr.msrb.gmra.mxu3 %v73_v17 }
  0x90   :  { %447 = vmatpush.msra.mxu0 %v420_v20  ;;  %467 = vmatpush.msra.mxu1 %v436_v28 }
  0x92   :  { %448 = vmatpush.msra.mxu0 %v419_v21  ;;  %468 = vmatpush.msra.mxu1 %v435_v30 }
  0x94   :  { %449 = vmatpush.msra.mxu0 %v418_v23  ;;  %469 = vmatpush.msra.mxu1 %v434_v33 }
  0x96   :  { %450 = vmatpush.msra.mxu0 %v417_v25  ;;  %470 = vmatpush.msra.mxu1 %v433_v36 }
  0x98   :  { %451 = vmatpush.msra.mxu0 %v416_v27  ;;  %471 = vmatpush.msra.mxu1 %v432_v39 }
  0x9a   :  { %452 = vmatpush.msra.mxu0 %v415_v29  ;;  %472 = vmatpush.msra.mxu1 %v431_v42 }
  0x9c   :  { %453 = vmatpush.msra.mxu0 %v414_v32  ;;  %473 = vmatpush.msra.mxu1 %v430_v45  ;;  %v571_v32 = vld [vmem:[%s821_s6] ss:$0 sm:$0xff] }
  0x9e   :  { %454 = vmatpush.msra.mxu0 %v413_v35  ;;  %474 = vmatpush.msra.mxu1 %v429_v49 }
  0xa0   :  { %455 = vmatpush.msra.mxu0 %v412_v38  ;;  %475 = vmatpush.msra.mxu1 %v428_v55 }
  0xa2   :  { %456 = vmatpush.msra.mxu0 %v411_v41  ;;  %476 = vmatpush.msra.mxu1 %v427_v58 }
  0xa4   :  { %457 = vmatpush.msra.mxu0 %v410_v44  ;;  %477 = vmatpush.msra.mxu1 %v426_v60 }
  0xa6   :  { %458 = vmatpush.msra.mxu0 %v409_v48  ;;  %478 = vmatpush.msra.mxu1 %v425_v63 }
  0xa8   :  { %459 = vmatpush.msra.mxu0 %v408_v54  ;;  %479 = vmatpush.msra.mxu1 %v424_v3 }
 0x103   :  { %v225_v37 = vpop.f32.mrf.mxu0  ;;  %v245_v43 = vpop.f32.mrf.mxu1 }
 0x104   :  { %v226_v40 = vadd.f32 %v225_v37, %v204_v34 }
 0x106   :  { %v246_v46 = vadd.f32 %v245_v43, %v226_v40  ;;  %v498_v43 = vlaneseq }
 0x108   :  { %v499_v45 = vshrl.u32 %v498_v43, 7 }
 0x10a   :  { %v265_v50 = vpop.f32.mrf.mxu2  ;;  %v285_v51 = vpop.f32.mrf.mxu3 }
 0x10b   :  { %v266_v52 = vadd.f32 %v265_v50, %v246_v46  ;;  %v305_v53 = vpop.f32.mrf.mxu0  ;;  %v325_v61 = vpop.f32.mrf.mxu1  ;;  %v572_v46 = vld [vmem:[%s817_s2] ss:$0 sm:$0xff]  ;;  %v647_v50 = vmov 0.0   ;;  %s648_s2 = smov [#allocation5]  }
 0x10c   :  { %v306_v57 = vadd.f32 %v305_v53, %v205_v47  ;;  %vm501_vm12 = vcmp.eq.s32.totalorder %v572_v46, %v499_v45  ;;  %s547_s26 = sshll.u32 %s648_s2, 4  ;;  %s548_s26 = int_to_ptr.vmem [resolvable:$true] %s547_s26 }
 0x10d   :  { %v286_v56 = vadd.f32 %v285_v51, %v266_v52  ;;  %v561_v51 = vsel %vm501_vm12, 1.0, %v647_v50 }
 0x10e   :  { %v326_v62 = vadd.f32 %v325_v61, %v306_v57 }
 0x10f   :  { %v559_v59 = vmul.f32 -1.442695, %v286_v56 }
 0x111   :  { %573 = vpow2.f32 %v559_v59 }
 0x112   :  { %v345_v1 = vpop.f32.mrf.mxu2  ;;  %v365_v4 = vpop.f32.mrf.mxu3 }
 0x113   :  { %v346_v2 = vadd.f32 %v345_v1, %v326_v62 }
 0x115   :  { %v366_v5 = vadd.f32 %v365_v4, %v346_v2 }
 0x117   :  { %v574_v6 = vpop.eup %573  ;;  %v560_v7 = vmul.f32 -1.442695, %v366_v5 }
 0x118   :  { %v374_v8 = vadd.f32 1.0, %v574_v6 }
 0x119   :  { %575 = vpow2.f32 %v560_v7 }
 0x11a   :  { %577 = vrcp.f32 %v374_v8  ;;  %v387_v14 = vand.u32 2147483648, %v374_v8  ;;  %v385_v16 = vand.u32 2147483647, %v374_v8  ;;  %vm381_vm4 = vweird.f32 %v374_v8 }
 0x11c   :  { %v388_v0 = vor.u32 1.1754944e-38, %v387_v14  ;;  %vm386_vm6 = vcmp.eq.f32.partialorder %v385_v16, 8.507059e+37 }
 0x11f   :  { %v576_v9 = vpop.eup %575 }
 0x120   :  { %v578_v10 = vpop.eup %577  ;;  %v375_v11 = vadd.f32 1.0, %v576_v9 }
 0x121   :  { %v377_v12 = vmul.f32 %v578_v10, %v374_v8  ;;  %vm382_vm3 = vweird.f32 %v578_v10 }
 0x122   :  { %579 = vrcp.f32 %v375_v11  ;;  %vm383_vm5 = vmor %vm381_vm4, %vm382_vm3  ;;  %v402_v24 = vand.u32 2147483648, %v375_v11  ;;  %v400_v26 = vand.u32 2147483647, %v375_v11  ;;  %vm396_vm8 = vweird.f32 %v375_v11 }
 0x123   :  { %v378_v13 = vsub.f32 1.0, %v377_v12 }
 0x124   :  { %v403_v28 = vor.u32 1.1754944e-38, %v402_v24  ;;  %vm401_vm10 = vcmp.eq.f32.partialorder %v400_v26, 8.507059e+37 }
 0x125   :  { %v379_v15 = vmul.f32 %v578_v10, %v378_v13 }
 0x127   :  { %v380_v17 = vadd.f32 %v578_v10, %v379_v15 }
 0x128   :  { %v580_v18 = vpop.eup %579 }
 0x129   :  { %v384_v19 = vsel %vm383_vm5, %v578_v10, %v380_v17  ;;  %v392_v20 = vmul.f32 %v580_v18, %v375_v11  ;;  %vm397_vm7 = vweird.f32 %v580_v18 }
 0x12a   :  { %v389_v21 = vsel %vm386_vm6, %v388_v0, %v384_v19  ;;  %vm398_vm9 = vmor %vm396_vm8, %vm397_vm7 }
 0x12b   :  { %v406_v22 = vmul.f32 %v389_v21, %v286_v56  ;;  %v393_v23 = vsub.f32 1.0, %v392_v20 }
 0x12d   :  { %v394_v25 = vmul.f32 %v580_v18, %v393_v23  ;;  %460 = vmatmul.f32.vlgmr.msra.gmra.mxu0 %v406_v22 }
 0x12f   :  { %v395_v27 = vadd.f32 %v580_v18, %v394_v25 }
 0x131   :  { %v399_v29 = vsel %vm398_vm9, %v580_v18, %v395_v27 }
 0x132   :  { %v404_v30 = vsel %vm401_vm10, %v403_v28, %v399_v29 }
 0x133   :  { %v407_v31 = vmul.f32 %v404_v30, %v366_v5 }
 0x135   :  { %480 = vmatmul.f32.vlgmr.msra.gmra.mxu1 %v407_v31 }
 0x1aa   :  { %v461_v33 = vpop.f32.mrf.mxu0 }
 0x1ab   :  { %v462_v34 = vadd.f32 %v571_v32, %v461_v33 }
 0x1b2   :  { %v481_v35 = vpop.f32.mrf.mxu1 }
 0x1b3   :  { %v482_v36 = vadd.f32 %v481_v35, %v462_v34 }
 0x1b5   :  { %v485_v37 = vsel %vm484_vm11, %v482_v36, -inf }
 0x1b6   :  { %486 = vmax.xlane.f32.xlu1 %v485_v37 }
 0x229   :  { %v487_v38 = vpop.xlane.xlu1 %486 }
 0x22a   :  { %v488_v39 = vsub.f32 %v482_v36, %v487_v38 }
 0x22c   :  { %v489_v40 = vmul.f32 1.442695, %v488_v39 }
 0x22e   :  { %581 = vpow2.f32 %v489_v40 }
 0x234   :  { %v582_v41 = vpop.eup %581 }
 0x235   :  { %v491_v42 = vsel %vm484_vm11, %v582_v41, 0.0 }
 0x236   :  { %492 = vadd.xlane.f32.xlu2 %v491_v42 }
 0x2a9   :  { %v493_v44 = vpop.xlane.xlu2 %492 }
 0x2aa   :  { %583 = vlog2.f32 %v493_v44 }
 0x2b0   :  { %v584_v47 = vpop.eup %583 }
 0x2b1   :  { %v495_v48 = vmul.f32 0.6931472, %v584_v47 }
 0x2b3   :  { %v496_v49 = vsub.f32 %v488_v39, %v495_v48 }
 0x2b5   :  { %523 = vmatpush.msra.mxu2 %v496_v49 }
 0x2b6   :  { %562 = vmatmul.msk.f32.vlgmr.msra.gmra.mxu2 %vm504_vm13, %v561_v51 }
 0x339   :  { %v525_v52 = vpop.f32.mrf.mxu2 }
 0x33a   :  { %v529_v53 = vsel %vm528_vm14, %v525_v52, -inf }
 0x33b   :  { %530 = vmax.xlane.f32.xlu2 %v529_v53 }
 0x3ae   :  { %v531_v54 = vpop.xlane.xlu2 %530 }
 0x3af   :  { %v532_v55 = vsub.f32 %v525_v52, %v531_v54 }
 0x3b1   :  { %v533_v56 = vmul.f32 1.442695, %v532_v55 }
 0x3b3   :  { %585 = vpow2.f32 %v533_v56 }
 0x3b9   :  { %v586_v57 = vpop.eup %585 }
 0x3ba   :  { %v535_v58 = vsel %vm528_vm14, %v586_v57, 0.0 }
 0x3bb   :  { %536 = vadd.xlane.f32.xlu0 %v535_v58 }
 0x42e   :  { %v537_v59 = vpop.xlane.xlu0 %536 }
 0x42f   :  { %587 = vlog2.f32 %v537_v59 }
 0x435   :  { %v588_v60 = vpop.eup %587 }
 0x436   :  { %v539_v61 = vmul.f32 0.6931472, %v588_v60 }
 0x438   :  { %v540_v62 = vsub.f32 %v532_v55, %v539_v61 }
 0x43a   :  { %541 = vst.msk [vmem:[#allocation5] sm:$0x3] %vm528_vm14, %v540_v62 }
 0x43b   :  { %552 = dma.vmem_to_hbm [thread:$0]  %s548_s26, 32, %s550_s29, [#allocation4]  }
 0x43c   :  { %639 = dma.done.wait [#allocation4], 32  }
 0x43d   :  { %640 = vsyncadd [#allocation4], 4294967264 }
 0x43e   :  { %557 = vsyncpa [#allocation3], 1 }
 0x43f   :  { %558 = vsyncpa [#allocation4], 1 }

</bundles_post_ra>
